<compile_context>
chip_gen: v5e
topology: v5e:2x2
jax: 0.10.0
libtpu: 0.0.40
codegen_flags: <defaults>
</compile_context>

<pallas_src>
import functools

import jax
import jax.numpy as jnp
from jax import lax
from jax.experimental import pallas as pl
from jax.experimental.pallas import tpu as pltpu


def _round_up(x, m):
    return (x + m - 1) // m * m


def _conv1d_kernel(xpad_ref, w_ref, b_ref, out_ref, *, K, dilation):
    """One batch element.

    xpad_ref : (1, T_pad, Cin_p)   zero-padded input, channels-last
    w_ref    : (K*Cin_p, Cout_p)   tap-major reshaped conv weight
    b_ref    : (1, Cout_p)         conv bias (zeros if bias disabled)
    out_ref  : (1, T_out, Cout_p)
    """
    T_out = out_ref.shape[1]
    xpad = xpad_ref[0]                                      # (T_pad, Cin_p)
    # im2col: lane-concatenate the K dilated shifted views.
    if K == 1:
        cols = xpad[:T_out, :]
    else:
        cols = jnp.concatenate(
            [xpad[k * dilation:k * dilation + T_out, :] for k in range(K)],
            axis=-1)                                        # (T_out, K*Cin_p)
    # Single MXU matmul with f32 accumulation, fused bias add.
    y = jnp.dot(cols, w_ref[...], preferred_element_type=jnp.float32)
    y = y + b_ref[...]
    out_ref[0] = y.astype(out_ref.dtype)


def conv_norm(x, weight, bias=None, *, stride=1, padding=None, dilation=1):
    """PyTorch-equivalent ConvNorm forward.

    x      : (B, Cin, T)       (NCT, as torch.nn.Conv1d expects)
    weight : (Cout, Cin, K)    PyTorch Conv1d weight layout
    bias   : (Cout,) or None
    returns: (B, Cout, T_out)
    """
    assert stride == 1, "TODO(synk): stride > 1 not implemented"
    Cout, Cin, K = weight.shape
    if padding is None:
        assert K % 2 == 1
        padding = dilation * (K - 1) // 2
    B, _, T = x.shape
    T_pad = T + 2 * padding
    T_out = T_pad - dilation * (K - 1)

    # Lane-dense channel padding (multiples of 128 lanes).
    Cin_p = _round_up(Cin, 128)
    Cout_p = _round_up(Cout, 128)

    # Channels-last + one-time time/channel zero padding.
    xt = jnp.transpose(x, (0, 2, 1))                              # (B, T, Cin)
    xt = jnp.pad(xt, ((0, 0), (padding, padding), (0, Cin_p - Cin)))

    # Weight: (Cout, Cin, K) -> tap-major (K, Cin_p, Cout_p) -> (K*Cin_p, Cout_p)
    w = jnp.transpose(weight, (2, 1, 0))                          # (K, Cin, Cout)
    w = jnp.pad(w, ((0, 0), (0, Cin_p - Cin), (0, Cout_p - Cout)))
    w2 = w.reshape(K * Cin_p, Cout_p)

    if bias is None:
        b = jnp.zeros((1, Cout_p), x.dtype)
    else:
        b = jnp.pad(bias, (0, Cout_p - Cout)).reshape(1, Cout_p).astype(x.dtype)

    out = pl.pallas_call(
        functools.partial(_conv1d_kernel, K=K, dilation=dilation),
        out_shape=jax.ShapeDtypeStruct((B, T_out, Cout_p), x.dtype),
        grid=(B,),
        in_specs=[
            pl.BlockSpec((1, T_pad, Cin_p), lambda bi: (bi, 0, 0)),
            pl.BlockSpec((K * Cin_p, Cout_p), lambda bi: (0, 0)),
            pl.BlockSpec((1, Cout_p), lambda bi: (0, 0)),
        ],
        out_specs=pl.BlockSpec((1, T_out, Cout_p), lambda bi: (bi, 0, 0)),
        compiler_params=pltpu.CompilerParams(
            dimension_semantics=("parallel",)),
    )(xt, w2, b)

    # Drop channel padding, back to PyTorch NCT layout.
    return jnp.transpose(out[:, :, :Cout], (0, 2, 1))


def _conv_norm_reference(x, weight, bias, *, stride=1, padding=None, dilation=1):
    """Pure-JAX reference with PyTorch Conv1d semantics."""
    Cout, Cin, K = weight.shape
    if padding is None:
        padding = dilation * (K - 1) // 2
    y = lax.conv_general_dilated(
        x, weight, window_strides=(stride,), padding=[(padding, padding)],
        rhs_dilation=(dilation,), dimension_numbers=("NCH", "OIH", "NCH"))
    if bias is not None:
        y = y + bias[None, :, None]
    return y


if __name__ == "__main__":
    # Small shapes consistent with ConvNorm usage (Conv1d on NCT input).
    B, Cin, Cout, T, K = 2, 4, 8, 16, 5

    key = jax.random.PRNGKey(0)
    kx, kw, kb = jax.random.split(key, 3)

    x = jax.random.normal(kx, (B, Cin, T), jnp.float32)
    bound = 1.0 / jnp.sqrt(Cin * K)
    weight = jax.random.uniform(kw, (Cout, Cin, K), jnp.float32, -bound, bound)
    bias = jax.random.uniform(kb, (Cout,), jnp.float32, -bound, bound)

    out = conv_norm(x, weight, bias)
    out = jax.block_until_ready(out)

    assert out.shape == (B, Cout, T), out.shape
    assert out.dtype == jnp.float32

    ref = _conv_norm_reference(x, weight, bias)
    assert jnp.allclose(out, ref, rtol=1e-3, atol=1e-3), (
        float(jnp.max(jnp.abs(out - ref))))
    print("KERNEL_OK")
</pallas_src>

<mosaic_0001>
module attributes {stable_mosaic.version = 11 : i64} {
  func.func @_conv1d_kernel(%arg0: i32, %arg1: memref<1x20x128xf32, #tpu.memory_space<vmem>>, %arg2: memref<640x128xf32, #tpu.memory_space<vmem>>, %arg3: memref<1x128xf32, #tpu.memory_space<vmem>>, %arg4: memref<1x16x128xf32, #tpu.memory_space<vmem>>) attributes {dimension_semantics = [#tpu.dimension_semantics<parallel>], iteration_bounds = array<i64: 2>, scalar_prefetch = 0 : i64, scratch_operands = 0 : i64, tpu.core_type = #tpu.core_type<tc>, window_params = [{transform_indices = @transform_0, window_bounds = array<i64: 1, 20, 128>}, {pipeline_mode = #tpu.pipeline_mode<synchronous>, transform_indices = @transform_1, window_bounds = array<i64: 640, 128>}, {pipeline_mode = #tpu.pipeline_mode<synchronous>, transform_indices = @transform_2, window_bounds = array<i64: 1, 128>}, {transform_indices = @transform_3, window_bounds = array<i64: 1, 16, 128>}]} {
    %c0 = arith.constant 0 : index
    %c0_0 = arith.constant 0 : index
    %c0_1 = arith.constant 0 : index
    %0 = vector.load %arg1[%c0, %c0_0, %c0_1] : memref<1x20x128xf32, #tpu.memory_space<vmem>>, vector<1x20x128xf32>
    %1 = vector.shape_cast %0 : vector<1x20x128xf32> to vector<20x128xf32>
    %2 = vector.extract_strided_slice %1 {offsets = [0, 0], sizes = [16, 128], strides = [1, 1]} : vector<20x128xf32> to vector<16x128xf32>
    %3 = vector.extract_strided_slice %1 {offsets = [1, 0], sizes = [16, 128], strides = [1, 1]} : vector<20x128xf32> to vector<16x128xf32>
    %4 = vector.extract_strided_slice %1 {offsets = [2, 0], sizes = [16, 128], strides = [1, 1]} : vector<20x128xf32> to vector<16x128xf32>
    %5 = vector.extract_strided_slice %1 {offsets = [3, 0], sizes = [16, 128], strides = [1, 1]} : vector<20x128xf32> to vector<16x128xf32>
    %6 = vector.extract_strided_slice %1 {offsets = [4, 0], sizes = [16, 128], strides = [1, 1]} : vector<20x128xf32> to vector<16x128xf32>
    %7 = tpu.concatenate %2, %3, %4, %5, %6 in 1 : vector<16x128xf32>, vector<16x128xf32>, vector<16x128xf32>, vector<16x128xf32>, vector<16x128xf32> -> vector<16x640xf32>
    %c0_2 = arith.constant 0 : index
    %c0_3 = arith.constant 0 : index
    %8 = vector.load %arg2[%c0_2, %c0_3] : memref<640x128xf32, #tpu.memory_space<vmem>>, vector<640x128xf32>
    %cst = arith.constant dense<0.000000e+00> : vector<16x128xf32>
    %9 = tpu.matmul %7, %8, %cst {dimension_numbers = #tpu.dot_dimension_numbers<[1], [0], [0], [1], [0, 0, 1, 1], [], []>} : vector<16x640xf32>, vector<640x128xf32>, vector<16x128xf32> -> vector<16x128xf32>
    %c0_4 = arith.constant 0 : index
    %c0_5 = arith.constant 0 : index
    %10 = vector.load %arg3[%c0_4, %c0_5] : memref<1x128xf32, #tpu.memory_space<vmem>>, vector<1x128xf32>
    %11 = vector.broadcast %10 : vector<1x128xf32> to vector<16x128xf32>
    %12 = arith.addf %9, %11 : vector<16x128xf32>
    %c0_6 = arith.constant 0 : index
    %c0_7 = arith.constant 0 : index
    %c0_8 = arith.constant 0 : index
    %13 = vector.load %arg4[%c0_6, %c0_7, %c0_8] : memref<1x16x128xf32, #tpu.memory_space<vmem>>, vector<1x16x128xf32>
    %14 = vector.shape_cast %13 : vector<1x16x128xf32> to vector<16x128xf32>
    %15 = vector.shape_cast %12 : vector<16x128xf32> to vector<1x16x128xf32>
    tpu.vector_store %arg4[%c0_6, %c0_7, %c0_8], %15 {strides = array<i32>} : memref<1x16x128xf32, #tpu.memory_space<vmem>>, vector<1x16x128xf32>,
    return
  }
  func.func @transform_0(%arg0: i32) -> (i32, i32, i32) {
    %c0_i32 = arith.constant 0 : i32
    %c0_i32_0 = arith.constant 0 : i32
    %c0_i32_1 = arith.constant 0 : i32
    return %arg0, %c0_i32, %c0_i32_0 : i32, i32, i32
  }
  func.func @transform_1(%arg0: i32) -> (i32, i32) {
    %c0_i32 = arith.constant 0 : i32
    %c0_i32_0 = arith.constant 0 : i32
    %c0_i32_1 = arith.constant 0 : i32
    return %c0_i32, %c0_i32_0 : i32, i32
  }
  func.func @transform_2(%arg0: i32) -> (i32, i32) {
    %c0_i32 = arith.constant 0 : i32
    %c0_i32_0 = arith.constant 0 : i32
    %c0_i32_1 = arith.constant 0 : i32
    return %c0_i32, %c0_i32_0 : i32, i32
  }
  func.func @transform_3(%arg0: i32) -> (i32, i32, i32) {
    %c0_i32 = arith.constant 0 : i32
    %c0_i32_0 = arith.constant 0 : i32
    %c0_i32_1 = arith.constant 0 : i32
    return %arg0, %c0_i32, %c0_i32_0 : i32, i32, i32
  }
}

</mosaic_0001>

<bundles_post_ra>
// kernel: tpu_custom_call.1
= control target key start
LH: loop header
LB: loop body
LE: loop exit
PB: predicated region body
PF: predicated region fallthrough
CT: control target
= control target key end

     0   :  { %8 = vsyncpa [#allocation3], 0  ;;  %s852_s0 = inlined_call_operand.vmem [shape: f32[2,20,128], index: 0, kind: input, shape index: {}]   ;;  %s853_s1 = inlined_call_operand.hbm [shape: f32[640,128], index: 1, kind: input, shape index: {}]   ;;  %s854_s2 = inlined_call_operand.vmem [shape: f32[1,128], index: 2, kind: input, shape index: {}]   ;;  %s855_s3 = inlined_call_operand.hbm [shape: f32[2,16,128], index: 3, kind: output, shape index: {}]  }
   0x1   :  { %9 = vsyncpa [#allocation4], 0 }
   0x2   :  { %11 = vsyncpa [#allocation4 + $0x1], 0  ;;  %s724_s12 = smov 0   ;;  %s726_s13 = smov 0  }
   0x3   :  { %s728_s14 = smov 0   ;;  %s730_s15 = smov 0  }
   0x4 LB: > { %s745_s16 = sadd.s32 4294967295, %s697_s15   ;;  %s515_s17 = sadd.s32 4294967294, %s697_s15   ;;  %s697_s15 = sphi %s730_s15, %s861_s15   ;;  %s693_s14 = sphi %s728_s14, %s860_s14   ;;  %s689_s13 = sphi %s726_s13, %s859_s13   ;;  %s685_s12 = sphi %s724_s12, %s858_s12  }
   0x5   : > { %s749_s18 = sadd.s32 1, %s697_s15   ;;  %s92_s19 = sadd.s32 1, %s693_s14 }
   0x6   : > { %s89_s20 = ssub.s32 %s697_s15, %s749_s18  ;;  %p102_p0 = scmp.ne.s32.totalorder %s693_s14, %s689_s13 }
   0x7   : > { %p90_p1 = scmp.eq.s32.totalorder %s89_s20, 0  ;;  %p103_p2 = scmp.eq.s32.totalorder %s745_s16, 1 }
   0x8   : > { %p108_p3 = scmp.ne.s32.totalorder %s689_s13, %s685_s12  ;;  %p109_p4 = scmp.eq.s32.totalorder %s515_s17, 1 }
   0x9   : > { %s760_s21 = scalar_select %p90_p1, %s693_s14, %s92_s19  }
   0xa   : > { %p762_p5 = por %p103_p2, %p102_p0  ;;  %p766_p6 = por %p109_p4, %p108_p3 }
   0xb   : > { %p516_p7 = scmp.ge.s32.totalorder %s697_s15, 1  ;;  %p116_p8 = scmp.lt.s32.totalorder %s697_s15, 3 }
   0xc   : > { %p560_p9 = scmp.eq.s32.totalorder %s745_s16, 0  ;;  %s127_s26 = sshll.u32 %s853_s1, 4  ;;  %s128_s26 = int_to_ptr.hbm [resolvable:$true] %s127_s26 }
   0xd   : > { %p117_p10 = pnand %p516_p7, %p116_p8  ;;  %s699_s27 = smov [#allocation2]  }
   0xe   : > { %s129_s28 = sshll.u32 %s699_s27, 4  ;;  %s700_s29 = smov 128   ;;  %s130_s28 = int_to_ptr.vmem [resolvable:$true] %s129_s28 }
   0xf   : > { %p552_p11 = pneg %p117_p10  ;;  %s701_s30 = smov 8  }
  0x10   : > { %156 = sbr.rel (%p117_p10) target bundleno = 219 (0xdb), region = 32 }
  0x11   : > { %p553_p12 = pnand %p560_p9, %p552_p11 }
  0x13   : > { %555 = dma.hbm_to_vmem [thread:$0]  (!%p553_p12), %s128_s26, 10240, %s130_s28, [#allocation3], %s700_s29, %s700_s29, %s701_s30  }
  0x15   : > { %676 = dma.done.wait (%p560_p9), [#allocation3], 10240  }
  0x16   : > { %678 = vsyncadd (%p560_p9), [#allocation3], 4294957056  ;;  %v239_v0 = vld [vmem:[#allocation2 + $0x78] sm:$0xff]  ;;  %v238_v2 = vld [vmem:[#allocation2 + $0x70] sm:$0xff]  ;;  %p181_p13 = scmp.lt.s32.totalorder %s745_s16, 1  ;;  %vm200_vm0 = vcmask 1045504  }
  0x17   : > { %v255_v1 = vld [vmem:[#allocation2 + $0xf8] sm:$0xff]  ;;  %308 = vmatpush.msra.mxu0 %v239_v0  ;;  %v254_v3 = vld [vmem:[#allocation2 + $0xf0] sm:$0xff]  ;;  %v237_v4 = vld [vmem:[#allocation2 + $0x68] sm:$0xff]  ;;  %vm208_vm1 = vcmask 1044480   ;;  %vm192_vm2 = vcmask 1046528   ;;  %vm216_vm3 = vcmask 1043456  }
  0x18   : > { %331 = vmatpush.msra.mxu1 %v255_v1  ;;  %v253_v5 = vld [vmem:[#allocation2 + $0xe8] sm:$0xff]  ;;  %v236_v6 = vld [vmem:[#allocation2 + $0x60] sm:$0xff]  ;;  %v271_v8 = vld [vmem:[#allocation2 + $0x178] sm:$0xff]  ;;  %s786_s4 = scalar_select %p181_p13, %s745_s16, 1 }
  0x19   : > { %309 = vmatpush.msra.mxu0 %v238_v2  ;;  %v252_v7 = vld [vmem:[#allocation2 + $0xe0] sm:$0xff]  ;;  %v270_v9 = vld [vmem:[#allocation2 + $0x170] sm:$0xff]  ;;  %v287_v10 = vld [vmem:[#allocation2 + $0x1f8] sm:$0xff]  ;;  %354 = vmatpush.msra.mxu2 %v271_v8  ;;  %s178_s11 = sand.u32 1, %s689_s13   ;;  %s528_s19 = sshll.u32 %s745_s16, 4 }
  0x1a   : > { %332 = vmatpush.msra.mxu1 %v254_v3  ;;  %v235_v11 = vld [vmem:[#allocation2 + $0x58] sm:$0xff]  ;;  %377 = vmatpush.msra.mxu3 %v287_v10  ;;  %v286_v13 = vld [vmem:[#allocation2 + $0x1f0] sm:$0xff]  ;;  %v269_v14 = vld [vmem:[#allocation2 + $0x168] sm:$0xff]  ;;  %s545_s5 = smul.u32 24, %s786_s4  ;;  %s521_s17 = sshll.u32 %s178_s11, 4 }
  0x1b   : > { %310 = vmatpush.msra.mxu0 %v237_v4  ;;  %v251_v12 = vld [vmem:[#allocation2 + $0xd8] sm:$0xff]  ;;  %v234_v15 = vld [vmem:[#allocation2 + $0x50] sm:$0xff]  ;;  %355 = vmatpush.msra.mxu2 %v270_v9  ;;  %v285_v17 = vld [vmem:[#allocation2 + $0x1e8] sm:$0xff]  ;;  %s437_s25 = scalar_lea.hbm %s855_s3, %s528_s19  ;;  %s180_s26 = scalar_lea.vmem [#allocation5], %s521_s17 }
  0x1c   : > { %333 = vmatpush.msra.mxu1 %v253_v5  ;;  %v250_v16 = vld [vmem:[#allocation2 + $0xd0] sm:$0xff]  ;;  %378 = vmatpush.msra.mxu3 %v286_v13  ;;  %v268_v18 = vld [vmem:[#allocation2 + $0x160] sm:$0xff]  ;;  %v233_v20 = vld [vmem:[#allocation2 + $0x48] sm:$0xff]  ;;  %s792_s8 = scalar_lea.vmem %s852_s0, %s545_s5  ;;  %s438_s27 = sshll.u32 %s180_s26, 4  ;;  %s439_s27 = int_to_ptr.vmem [resolvable:$true] %s438_s27 }
  0x1d   : > { %311 = vmatpush.msra.mxu0 %v236_v6  ;;  %v284_v19 = vld [vmem:[#allocation2 + $0x1e0] sm:$0xff]  ;;  %v249_v21 = vld [vmem:[#allocation2 + $0xc8] sm:$0xff]  ;;  %356 = vmatpush.msra.mxu2 %v269_v14  ;;  %v267_v22 = vld [vmem:[#allocation2 + $0x158] sm:$0xff]  ;;  %s440_s28 = sshll.u32 %s437_s25, 4  ;;  %s426_s16 = scalar_lea.sflag [#allocation4], %s178_s11  ;;  %s441_s28 = int_to_ptr.hbm [resolvable:$true] %s440_s28 }
  0x1e   : > { %334 = vmatpush.msra.mxu1 %v252_v7  ;;  %379 = vmatpush.msra.mxu3 %v285_v17  ;;  %v283_v23 = vld [vmem:[#allocation2 + $0x1d8] sm:$0xff]  ;;  %v232_v24 = vld [vmem:[#allocation2 + $0x40] sm:$0xff]  ;;  %v266_v26 = vld [vmem:[#allocation2 + $0x150] sm:$0xff]  ;;  %s645_s29 = sshra.s32 %s441_s28, 4  ;;  %s651_s6 = scalar_lea.hbm %s855_s3, 32  ;;  %s646_s29 = int_to_ptr.hbm [resolvable:$true] %s645_s29 }
  0x1f   : > { %312 = vmatpush.msra.mxu0 %v235_v11  ;;  %v248_v25 = vld [vmem:[#allocation2 + $0xc0] sm:$0xff]  ;;  %357 = vmatpush.msra.mxu2 %v268_v18  ;;  %v282_v27 = vld [vmem:[#allocation2 + $0x1d0] sm:$0xff]  ;;  %v231_v28 = vld [vmem:[#allocation2 + $0x38] sm:$0xff]  ;;  %s647_s30 = scalar_lea.hbm %s646_s29, 16  ;;  %p652_p3 = scmp.lt.s32.totalorder %s646_s29, %s855_s3 }
  0x20   : > { %335 = vmatpush.msra.mxu1 %v251_v12  ;;  %380 = vmatpush.msra.mxu3 %v284_v19  ;;  %v247_v29 = vld [vmem:[#allocation2 + $0xb8] sm:$0xff]  ;;  %v265_v30 = vld [vmem:[#allocation2 + $0x148] sm:$0xff]  ;;  %v230_v32 = vld [vmem:[#allocation2 + $0x30] sm:$0xff]  ;;  %p648_p0 = scmp.ne.s32.totalorder %s646_s29, %s647_s30  ;;  %p653_p4 = scmp.lt.s32.totalorder %s651_s6, %s647_s30 }
  0x21   : > { %313 = vmatpush.msra.mxu0 %v234_v15  ;;  %358 = vmatpush.msra.mxu2 %v267_v22  ;;  %v281_v31 = vld [vmem:[#allocation2 + $0x1c8] sm:$0xff]  ;;  %v246_v33 = vld [vmem:[#allocation2 + $0xb0] sm:$0xff]  ;;  %v264_v34 = vld [vmem:[#allocation2 + $0x140] sm:$0xff] }
  0x22   : > { %336 = vmatpush.msra.mxu1 %v250_v16  ;;  %381 = vmatpush.msra.mxu3 %v283_v23  ;;  %v280_v35 = vld [vmem:[#allocation2 + $0x1c0] sm:$0xff]  ;;  %v229_v36 = vld [vmem:[#allocation2 + $0x28] sm:$0xff]  ;;  %v263_v38 = vld [vmem:[#allocation2 + $0x138] sm:$0xff]  ;;  %p649_p1 = pnand %p648_p0, %p762_p5  ;;  %p654_p7 = por %p653_p4, %p652_p3 }
  0x23   : > { %314 = vmatpush.msra.mxu0 %v233_v20  ;;  %359 = vmatpush.msra.mxu2 %v266_v26  ;;  %v245_v37 = vld [vmem:[#allocation2 + $0xa8] sm:$0xff]  ;;  %v279_v39 = vld [vmem:[#allocation2 + $0x1b8] sm:$0xff]  ;;  %v228_v40 = vld [vmem:[#allocation2 + $0x20] sm:$0xff] }
  0x24   : > { %337 = vmatpush.msra.mxu1 %v249_v21  ;;  %382 = vmatpush.msra.mxu3 %v282_v27  ;;  %v244_v41 = vld [vmem:[#allocation2 + $0xa0] sm:$0xff]  ;;  %v262_v42 = vld [vmem:[#allocation2 + $0x130] sm:$0xff]  ;;  %v227_v44 = vld [vmem:[#allocation2 + $0x18] sm:$0xff]  ;;  %p650_p2 = pneg %p649_p1 }
  0x25   : > { %315 = vmatpush.msra.mxu0 %v232_v24  ;;  %360 = vmatpush.msra.mxu2 %v265_v30  ;;  %v278_v43 = vld [vmem:[#allocation2 + $0x1b0] sm:$0xff]  ;;  %v243_v45 = vld [vmem:[#allocation2 + $0x98] sm:$0xff]  ;;  %v261_v46 = vld [vmem:[#allocation2 + $0x128] sm:$0xff] }
  0x26   : > { %338 = vmatpush.msra.mxu1 %v248_v25  ;;  %383 = vmatpush.msra.mxu3 %v281_v31  ;;  %v277_v47 = vld [vmem:[#allocation2 + $0x1a8] sm:$0xff]  ;;  %v226_v48 = vld [vmem:[#allocation2 + $0x10] sm:$0xff]  ;;  %v260_v50 = vld [vmem:[#allocation2 + $0x120] sm:$0xff]  ;;  %p655_p8 = pnand %p654_p7, %p650_p2 }
  0x27   : > { %316 = vmatpush.msra.mxu0 %v231_v28  ;;  %361 = vmatpush.msra.mxu2 %v264_v34  ;;  %v242_v49 = vld [vmem:[#allocation2 + $0x90] sm:$0xff]  ;;  %v276_v51 = vld [vmem:[#allocation2 + $0x1a0] sm:$0xff]  ;;  %v225_v52 = vld [vmem:[#allocation2 + $0x8] sm:$0xff] }
  0x28   : > { %339 = vmatpush.msra.mxu1 %v247_v29  ;;  %384 = vmatpush.msra.mxu3 %v280_v35  ;;  %v241_v53 = vld [vmem:[#allocation2 + $0x88] sm:$0xff]  ;;  %v259_v54 = vld [vmem:[#allocation2 + $0x118] sm:$0xff]  ;;  %v224_v56 = vld [vmem:[#allocation2] sm:$0xff] }
  0x29   : > { %317 = vmatpush.msra.mxu0 %v230_v32  ;;  %362 = vmatpush.msra.mxu2 %v263_v38  ;;  %v275_v55 = vld [vmem:[#allocation2 + $0x198] sm:$0xff]  ;;  %v240_v57 = vld [vmem:[#allocation2 + $0x80] sm:$0xff]  ;;  %v798_v60 = vld [vmem:[%s792_s8 + $0x8] sm:$0xff] }
  0x2a   : > { %340 = vmatpush.msra.mxu1 %v246_v33  ;;  %385 = vmatpush.msra.mxu3 %v279_v39  ;;  %v303_v58 = vld [vmem:[#allocation2 + $0x278] sm:$0xff]  ;;  %v795_v59 = vld [vmem:[%s792_s8] sm:$0xff]  ;;  %v258_v61 = vld [vmem:[#allocation2 + $0x110] sm:$0xff]  ;;  %v202_v3 = vrot.slane %v798_v60, 2  ;;  %v210_v8 = vrot.slane %v798_v60, 3  ;;  %v194_v10 = vrot.slane %v798_v60, 1 }
  0x2b   : > { %318 = vmatpush.msra.mxu0 %v229_v36  ;;  %363 = vmatpush.msra.mxu2 %v262_v42  ;;  %v274_v62 = vld [vmem:[#allocation2 + $0x190] sm:$0xff]  ;;  %v257_v0 = vld [vmem:[#allocation2 + $0x108] sm:$0xff]  ;;  %v201_v2 = vrot.slane %v795_v59, 2  ;;  %v256_v5 = vld [vmem:[#allocation2 + $0x100] sm:$0xff]  ;;  %v209_v7 = vrot.slane %v795_v59, 3  ;;  %v193_v9 = vrot.slane %v795_v59, 1 }
  0x2c   : > { %341 = vmatpush.msra.mxu1 %v245_v37  ;;  %386 = vmatpush.msra.mxu3 %v278_v43  ;;  %v302_v63 = vld [vmem:[#allocation2 + $0x270] sm:$0xff]  ;;  %v273_v1 = vld [vmem:[#allocation2 + $0x188] sm:$0xff]  ;;  %v272_v6 = vld [vmem:[#allocation2 + $0x180] sm:$0xff]  ;;  %v217_v32 = vrot.slane %v795_v59, 4  ;;  %v218_v33 = vrot.slane %v798_v60, 4 }
  0x2d   : > { %319 = vmatpush.msra.mxu0 %v228_v40  ;;  %364 = vmatpush.msra.mxu2 %v261_v46  ;;  %v301_v4 = vld [vmem:[#allocation2 + $0x268] sm:$0xff]  ;;  %v300_v11 = vld [vmem:[#allocation2 + $0x260] sm:$0xff]  ;;  %v203_v12 = vsel %vm200_vm0, %v201_v2, %v202_v3  ;;  %v299_v13 = vld [vmem:[#allocation2 + $0x258] sm:$0xff]  ;;  %v211_v15 = vsel %vm208_vm1, %v209_v7, %v210_v8  ;;  %v195_v16 = vsel %vm192_vm2, %v193_v9, %v194_v10 }
  0x2e   : > { %342 = vmatpush.msra.mxu1 %v244_v41  ;;  %387 = vmatpush.msra.mxu3 %v277_v47  ;;  %v188_v14 = vld [vmem:[%s792_s8 + $0x10] sm:$0xf]  ;;  %v297_v19 = vld [vmem:[#allocation2 + $0x248] sm:$0xff]  ;;  %v296_v22 = vld [vmem:[#allocation2 + $0x240] sm:$0xff]  ;;  %v219_v37 = vsel %vm216_vm3, %v217_v32, %v218_v33 }
  0x2f   : > { %320 = vmatpush.msra.mxu0 %v227_v44  ;;  %365 = vmatpush.msra.mxu2 %v260_v50  ;;  %v298_v17 = vld [vmem:[#allocation2 + $0x250] sm:$0xff]  ;;  %v204_v18 = vrot.slane %v188_v14, 2  ;;  %v212_v20 = vrot.slane %v188_v14, 3  ;;  %v196_v21 = vrot.slane %v188_v14, 1  ;;  %v295_v24 = vld [vmem:[#allocation2 + $0x238] sm:$0xff]  ;;  %v293_v28 = vld [vmem:[#allocation2 + $0x228] sm:$0xff] }
  0x30   : > { %343 = vmatpush.msra.mxu1 %v243_v45  ;;  %388 = vmatpush.msra.mxu3 %v276_v51  ;;  %v294_v27 = vld [vmem:[#allocation2 + $0x230] sm:$0xff]  ;;  %v292_v29 = vld [vmem:[#allocation2 + $0x220] sm:$0xff]  ;;  %v291_v30 = vld [vmem:[#allocation2 + $0x218] sm:$0xff]  ;;  %v220_v34 = vrot.slane %v188_v14, 4 }
  0x31   : > { %321 = vmatpush.msra.mxu0 %v226_v48  ;;  %366 = vmatpush.msra.mxu2 %v259_v54  ;;  %v205_v23 = vsel %vm200_vm0, %v202_v3, %v204_v18  ;;  %v213_v25 = vsel %vm208_vm1, %v210_v8, %v212_v20  ;;  %v197_v26 = vsel %vm192_vm2, %v194_v10, %v196_v21  ;;  %v290_v31 = vld [vmem:[#allocation2 + $0x210] sm:$0xff]  ;;  %v289_v35 = vld [vmem:[#allocation2 + $0x208] sm:$0xff]  ;;  %v288_v36 = vld [vmem:[#allocation2 + $0x200] sm:$0xff] }
  0x32   : > { %344 = vmatpush.msra.mxu1 %v242_v49  ;;  %389 = vmatpush.msra.mxu3 %v275_v55  ;;  %v221_v38 = vsel %vm216_vm3, %v218_v33, %v220_v34  ;;  %v600_v42 = vld [vmem:[%s854_s2] ss:$0 sm:$0xff] }
  0x33   : > { %322 = vmatpush.msra.mxu0 %v225_v52  ;;  %367 = vmatpush.msra.mxu2 %v258_v61 }
  0x34   : > { %345 = vmatpush.msra.mxu1 %v241_v53  ;;  %390 = vmatpush.msra.mxu3 %v274_v62 }
  0x35   : > { %323 = vmatpush.msra.mxu0 %v224_v56  ;;  %368 = vmatpush.msra.mxu2 %v257_v0 }
  0x36   : > { %346 = vmatpush.msra.mxu1 %v240_v57  ;;  %391 = vmatpush.msra.mxu3 %v273_v1 }
  0x37   : > { %400 = vmatpush.msrb.mxu0 %v303_v58  ;;  %369 = vmatpush.msra.mxu2 %v256_v5 }
  0x38   : > { %529 = vmatpush.msrb.mxu1 %v303_v58  ;;  %392 = vmatpush.msra.mxu3 %v272_v6 }
  0x39   : > { %401 = vmatpush.msrb.mxu0 %v302_v63  ;;  %370 = vmatmul.f32.vlgmr.msra.gmra.mxu2 %v203_v12 }
  0x3a   : > { %530 = vmatpush.msrb.mxu1 %v302_v63  ;;  %324 = vmatmul.f32.vlgmr.msra.gmra.mxu0 %v795_v59 }
  0x3b   : > { %402 = vmatpush.msrb.mxu0 %v301_v4  ;;  %393 = vmatmul.f32.vlgmr.msra.gmra.mxu3 %v211_v15 }
  0x3c   : > { %531 = vmatpush.msrb.mxu1 %v301_v4 }
  0x3d   : > { %403 = vmatpush.msrb.mxu0 %v300_v11  ;;  %347 = vmatmul.f32.vlgmr.msra.gmra.mxu1 %v195_v16 }
  0x3e   : > { %532 = vmatpush.msrb.mxu1 %v300_v11 }
  0x3f   : > { %404 = vmatpush.msrb.mxu0 %v299_v13 }
  0x40   : > { %533 = vmatpush.msrb.mxu1 %v299_v13 }
  0x41   : > { %405 = vmatpush.msrb.mxu0 %v298_v17  ;;  %373 = vmatmul.f32.gmra.mxu2 %v205_v23 }
  0x42   : > { %534 = vmatpush.msrb.mxu1 %v298_v17  ;;  %327 = vmatmul.f32.gmra.mxu0 %v798_v60 }
  0x43   : > { %406 = vmatpush.msrb.mxu0 %v297_v19  ;;  %396 = vmatmul.f32.gmra.mxu3 %v213_v25 }
  0x44   : > { %535 = vmatpush.msrb.mxu1 %v297_v19 }
  0x45   : > { %407 = vmatpush.msrb.mxu0 %v296_v22  ;;  %350 = vmatmul.f32.gmra.mxu1 %v197_v26 }
  0x46   : > { %536 = vmatpush.msrb.mxu1 %v296_v22 }
  0x47   : > { %408 = vmatpush.msrb.mxu0 %v295_v24 }
  0x48   : > { %537 = vmatpush.msrb.mxu1 %v295_v24 }
  0x49   : > { %409 = vmatpush.msrb.mxu0 %v294_v27 }
  0x4a   : > { %538 = vmatpush.msrb.mxu1 %v294_v27 }
  0x4b   : > { %410 = vmatpush.msrb.mxu0 %v293_v28 }
  0x4c   : > { %539 = vmatpush.msrb.mxu1 %v293_v28 }
  0x4d   : > { %411 = vmatpush.msrb.mxu0 %v292_v29 }
  0x4e   : > { %540 = vmatpush.msrb.mxu1 %v292_v29 }
  0x4f   : > { %412 = vmatpush.msrb.mxu0 %v291_v30 }
  0x50   : > { %541 = vmatpush.msrb.mxu1 %v291_v30 }
  0x51   : > { %413 = vmatpush.msrb.mxu0 %v290_v31 }
  0x52   : > { %542 = vmatpush.msrb.mxu1 %v290_v31 }
  0x53   : > { %414 = vmatpush.msrb.mxu0 %v289_v35 }
  0x54   : > { %543 = vmatpush.msrb.mxu1 %v289_v35 }
  0x55   : > { %415 = vmatpush.msrb.mxu0 %v288_v36 }
  0x56   : > { %544 = vmatpush.msrb.mxu1 %v288_v36  ;;  %416 = vmatmul.f32.vlgmr.msrb.gmra.mxu0 %v219_v37 }
  0x57   : > { %419 = vmatmul.f32.vlgmr.msrb.gmra.mxu1 %v221_v38 }
  0xb7   : > { %v325_v39 = vpop.f32.mrf.mxu0 }
  0xb8   : > { %v326_v45 = vadd.f32 %v600_v42, %v325_v39 }
  0xba   : > { %v348_v40 = vpop.f32.mrf.mxu1 }
  0xbb   : > { %v349_v48 = vadd.f32 %v348_v40, %v326_v45 }
  0xbc   : > { %v371_v41 = vpop.f32.mrf.mxu2 }
  0xbd   : > { %v372_v51 = vadd.f32 %v371_v41, %v349_v48 }
  0xbe   : > { %v394_v44 = vpop.f32.mrf.mxu3 }
  0xbf   : > { %v328_v43 = vpop.f32.mrf.mxu0  ;;  %v395_v54 = vadd.f32 %v394_v44, %v372_v51 }
  0xc0   : > { %v329_v46 = vadd.f32 %v600_v42, %v328_v43 }
  0xc2   : > { %v351_v47 = vpop.f32.mrf.mxu1 }
  0xc3   : > { %v352_v49 = vadd.f32 %v351_v47, %v329_v46 }
  0xc4   : > { %v374_v50 = vpop.f32.mrf.mxu2 }
  0xc5   : > { %v375_v52 = vadd.f32 %v374_v50, %v352_v49 }
  0xc6   : > { %v397_v53 = vpop.f32.mrf.mxu3 }
  0xc7   : > { %v398_v55 = vadd.f32 %v397_v53, %v375_v52 }
  0xd3   : > { %v417_v56 = vpop.f32.mrf.mxu0 }
  0xd4   : > { %v420_v57 = vpop.f32.mrf.mxu1  ;;  %v418_v58 = vadd.f32 %v417_v56, %v395_v54 }
  0xd5   : > { %v421_v59 = vadd.f32 %v420_v57, %v398_v55 }
  0xd6   : > { %423 = vst [vmem:[%s180_s26] sm:$0xff] %v418_v58 }
  0xd7   : > { %424 = vst [vmem:[%s180_s26 + $0x8] sm:$0xff] %v421_v59 }
  0xd8   : > { %658 = shalt.err (!%p655_p8)
}
  0xd9   : > { %s702_s9 = smov 128   ;;  %s703_s10 = smov 8  }
  0xda   : > { %550 = dma.vmem_to_hbm [thread:$0]  (%p762_p5), %s439_s27, 256, %s441_s28, %s426_s16, %s702_s9, %s702_s9, %s703_s10  }
  0xdb PF: > { %p562_p9 = scmp.ge.s32.totalorder %s697_s15, 2  ;;  %s455_s11 = sand.u32 1, %s685_s12  }
  0xdc   : > { %s456_s17 = scalar_lea.sflag [#allocation4], %s455_s11 }
  0xdd   : > { %p557_p10 = pnand %p562_p9, %p766_p6 }
  0xdf   : > { %p558_p11 = pneg %p557_p10 }
  0xe1   : > { %680 = dma.done.wait (%p558_p11), %s456_s17, 256  }
  0xe2   : > { %682 = vsyncadd (%p558_p11), %s456_s17, 4294967040  ;;  %p14_p12 = scmp.ge.s32.totalorder %s749_s18, 4   ;;  %s858_s12 = smov %s689_s13 }
  0xe3   : > { %s859_s13 = smov %s693_s14  ;;  %s860_s14 = smov %s760_s21 }
  0xe4   : > { %s861_s15 = smov %s749_s18  ;;  %16 = sbr.rel (!%p14_p12) target bundleno = 4 (0x4), region = 72 }
  0xe9   :  { %462 = vsyncpa [#allocation3], 1 }
  0xea   :  { %464 = vsyncpa [#allocation3 + $0x1], 1 }
  0xeb   :  { %465 = vsyncpa [#allocation4], 1 }
  0xec   :  { %467 = vsyncpa [#allocation4 + $0x1], 1 }

</bundles_post_ra>
